<compile_context>
chip_gen: v7x
topology: tpu7x:2x2x1
jax: 0.10.0
libtpu: 0.0.40
codegen_flags: <defaults>
</compile_context>

<pallas_src>
import functools

import jax
import jax.numpy as jnp
from jax import lax
from jax.experimental import pallas as pl
from jax.experimental.pallas import tpu as pltpu


def _round_up(x, m):
    return ((x + m - 1) // m) * m


def _round_down(x, m):
    return (x // m) * m


def _default_block_bytes():
    """Per-input, per-pipeline-buffer streaming budget (generation aware)."""
    try:
        kind = jax.devices()[0].device_kind.lower()
    except Exception:
        kind = ""
    # v6e / v7x: 32 MiB scoped-VMEM default comfortably fits 4 MiB per input
    # per buffer (2 inputs x 2 buffers x 4 MiB = 16 MiB of streaming buffers).
    if ("v6" in kind) or ("v7" in kind) or ("tpu7" in kind):
        return 4 * 1024 * 1024
    # v5e (16 MiB scoped default) and anything unknown: stay at 2 MiB.
    return 2 * 1024 * 1024


def _choose_2d_view(total, shape):
    """Pick a free (bitcast) 2-D (rows, lanes) view of the flattened input."""
    # Prefer a fully flattened, lane-dense view when the element count allows.
    for lanes in (512, 256, 128):
        if total % (8 * lanes) == 0:
            return total // lanes, lanes
    # Otherwise collapse leading dims; keep the true last dim on lanes so the
    # reshape stays a no-copy bitcast and every HBM block read is contiguous.
    lanes = shape[-1]
    return total // lanes, lanes


def _hinge_kernel(x_ref, t_ref, o_ref, *, margin, sub, nslabs, block_rows,
                  total_rows, needs_mask, unroll):
    i = pl.program_id(0)  # reduction ("arbitrary") axis over row blocks

    # The output block is pinned to the same (sub, lanes) tile for every grid
    # step, so it is VMEM-resident across the whole reduction: zero it once,
    # accumulate into it directly (no separate scratch, no final copy).
    @pl.when(i == 0)
    def _init():
        o_ref[...] = jnp.zeros_like(o_ref)

    lanes = o_ref.shape[-1]
    if needs_mask:
        # Hoisted once per step: sublane-row index within one slab.
        sub_iota = lax.broadcasted_iota(jnp.int32, (sub, lanes), 0)

    def accumulate(row_in_block):
        xs = x_ref[pl.ds(row_in_block, sub), :].astype(jnp.float32)
        ts = t_ref[pl.ds(row_in_block, sub), :].astype(jnp.float32)
        h = jnp.maximum(margin - xs * ts, 0.0)
        if needs_mask:
            # Rows at/after the true row count come from the unspecified pad
            # region of a partial edge block; select (not multiply) them away
            # so even NaN/Inf garbage contributes exactly 0 to the sum.
            rows_left = total_rows - (i * block_rows + row_in_block)
            h = jnp.where(sub_iota < rows_left, h, 0.0)
        o_ref[...] += h

    if nslabs == 1:
        accumulate(0)
    else:
        # Stream slab-by-slab through vregs; no full-block hinge temporary.
        def body(j, carry):
            accumulate(pl.multiple_of(j * sub, sub))
            return carry

        lax.fori_loop(0, nslabs, body, None, unroll=unroll)


def hinge_loss(x, target, margin=1.0, *, block_bytes=None, unroll=8):
    """Pallas TPU implementation of HingeLoss.forward.  Returns a scalar f32.

    Works for arbitrary input shapes/dtypes; inputs are streamed in their own
    dtype and accumulated in float32.  No host-side pad/concat copies.
    """
    assert x.shape == target.shape, (x.shape, target.shape)
    total = int(x.size)
    if total == 0:
        return jnp.array(jnp.nan, dtype=jnp.float32)  # torch: mean of empty
    if x.ndim == 0:
        prod = x.astype(jnp.float32) * target.astype(jnp.float32)
        return jnp.maximum(jnp.float32(margin) - prod, 0.0)

    rows, lanes = _choose_2d_view(total, x.shape)
    itemsize = max(x.dtype.itemsize, target.dtype.itemsize)
    lanes_padded = _round_up(lanes, 128)  # VMEM lane padding, for sizing only

    # TODO(synk): add lane-dimension tiling for pathologically wide,
    # non-flattenable last dims; plain XLA handles that rare case for now.
    if 8 * lanes_padded * itemsize * 4 > 24 * 1024 * 1024:
        xf = x.astype(jnp.float32).ravel()
        tf = target.astype(jnp.float32).ravel()
        return jnp.mean(jnp.maximum(jnp.float32(margin) - xf * tf, 0.0))

    x2 = jnp.reshape(x, (rows, lanes))       # free bitcast reshape
    t2 = jnp.reshape(target, (rows, lanes))  # free bitcast reshape

    if block_bytes is None:
        block_bytes = _default_block_bytes()

    if rows < 8:
        # Tiny input: one full (rows, lanes) block, no masking, no slab loop.
        sub, block_rows, nblocks, nslabs, needs_mask = rows, rows, 1, 1, False
    else:
        sub = 8
        budget_rows = max(8, _round_down(block_bytes // (lanes_padded * itemsize), 8))
        block_rows = min(budget_rows, _round_down(rows, 8))
        nblocks = pl.cdiv(rows, block_rows)
        nslabs = block_rows // 8
        needs_mask = (rows % block_rows) != 0

    kernel = functools.partial(
        _hinge_kernel,
        margin=float(margin),
        sub=sub,
        nslabs=nslabs,
        block_rows=block_rows,
        total_rows=rows,
        needs_mask=needs_mask,
        unroll=max(1, min(unroll, nslabs)),
    )

    cost = pl.CostEstimate(
        flops=3 * total,
        transcendentals=0,
        bytes_accessed=total * x.dtype.itemsize + total * target.dtype.itemsize
        + sub * lanes * 4,
    )

    partials = pl.pallas_call(
        kernel,
        out_shape=jax.ShapeDtypeStruct((sub, lanes), jnp.float32),
        grid_spec=pltpu.PrefetchScalarGridSpec(
            num_scalar_prefetch=0,
            grid=(nblocks,),
            in_specs=[
                pl.BlockSpec((block_rows, lanes), lambda i: (i, 0)),
                pl.BlockSpec((block_rows, lanes), lambda i: (i, 0)),
            ],
            out_specs=pl.BlockSpec((sub, lanes), lambda i: (0, 0)),
        ),
        compiler_params=pltpu.CompilerParams(
            # Single sequential reduction axis.  On v7x a 2-TensorCore split
            # would need verified core-parallel semantics / pl.core_map; the
            # plain "parallel" axis used previously measured as pure overhead.
            dimension_semantics=("arbitrary",),
        ),
        cost_estimate=cost,
    )(x2, t2)

    # Single final cross-lane reduction + mean on the tiny partial-sum slab.
    # (For total > 2**24 the f32 divisor rounds; acceptable for a loss value.)
    return jnp.sum(partials) / total


if __name__ == "__main__":
    key = jax.random.PRNGKey(0)
    k1, k2, k3, k4, k5, k6, k7, k8 = jax.random.split(key, 8)

    def ref_loss(xx, tt, margin=1.0):
        xf = xx.astype(jnp.float32)
        tf = tt.astype(jnp.float32)
        return jnp.mean(jnp.maximum(margin - xf * tf, 0.0))

    def rand_pm1(k, shape, dtype):
        s = jnp.sign(jax.random.normal(k, shape, dtype=jnp.float32))
        return jnp.where(s == 0, 1.0, s).astype(dtype)

    # 1) Aligned case -> lane-dense flattened (8, 512) view, single block.
    x1 = jax.random.normal(k1, (32, 128), dtype=jnp.float32)
    t1 = rand_pm1(k2, (32, 128), jnp.float32)
    got1 = jax.block_until_ready(hinge_loss(x1, t1))
    assert jnp.allclose(got1, ref_loss(x1, t1), rtol=1e-4, atol=1e-6), got1

    # 2) Ragged tiny case -> single full (5, 37) block, no padding copies.
    x2 = jax.random.normal(k3, (5, 37), dtype=jnp.float32)
    t2 = rand_pm1(k4, (5, 37), jnp.float32)
    got2 = jax.block_until_ready(hinge_loss(x2, t2))
    assert jnp.allclose(got2, ref_loss(x2, t2), rtol=1e-4, atol=1e-6), got2

    # 3) Multi-block path: small forced block budget exercises the slab loop,
    #    the partial edge block, and the in-kernel row mask on small data.
    x3 = jax.random.normal(k5, (52, 160), dtype=jnp.float32)
    t3 = rand_pm1(k6, (52, 160), jnp.float32)
    got3 = jax.block_until_ready(hinge_loss(x3, t3, block_bytes=16 * 1024))
    assert jnp.allclose(got3, ref_loss(x3, t3), rtol=1e-4, atol=1e-6), got3

    # 4) bf16 inputs -> dtype-aware blocks, f32 in-kernel accumulation, mask.
    x4 = jax.random.normal(k7, (13, 384), dtype=jnp.float32).astype(jnp.bfloat16)
    t4 = rand_pm1(k8, (13, 384), jnp.bfloat16)
    got4 = jax.block_until_ready(hinge_loss(x4, t4))
    assert jnp.allclose(got4, ref_loss(x4, t4), rtol=1e-3, atol=1e-5), got4

    print("KERNEL_OK")
</pallas_src>

<mosaic_0001>
module attributes {stable_mosaic.version = 11 : i64} {
  func.func @_hinge_kernel(%arg0: i32, %arg1: memref<8x512xf32, #tpu.memory_space<vmem>>, %arg2: memref<8x512xf32, #tpu.memory_space<vmem>>, %arg3: memref<8x512xf32, #tpu.memory_space<vmem>>) attributes {dimension_semantics = [#tpu.dimension_semantics<arbitrary>], iteration_bounds = array<i64: 1>, scalar_prefetch = 0 : i64, scratch_operands = 0 : i64, tpu.core_type = #tpu.core_type<tc>, window_params = [{transform_indices = @transform_0, window_bounds = array<i64: 8, 512>}, {transform_indices = @transform_1, window_bounds = array<i64: 8, 512>}, {pipeline_mode = #tpu.pipeline_mode<synchronous>, transform_indices = @transform_2, window_bounds = array<i64: 8, 512>}]} {
    %c0_i32 = arith.constant 0 : i32
    %0 = arith.cmpi eq, %arg0, %c0_i32 : i32
    %1 = arith.extui %0 : i1 to i32
    %c0_i32_0 = arith.constant 0 : i32
    %2 = arith.cmpi ne, %1, %c0_i32_0 : i32
    scf.if %2 {
      %cst_9 = arith.constant 0.000000e+00 : f32
      %13 = vector.broadcast %cst_9 : f32 to vector<8x512xf32>
      %c0_10 = arith.constant 0 : index
      %c0_11 = arith.constant 0 : index
      %14 = vector.load %arg3[%c0_10, %c0_11] : memref<8x512xf32, #tpu.memory_space<vmem>>, vector<8x512xf32>
      tpu.vector_store %arg3[%c0_10, %c0_11], %13 {strides = array<i32>} : memref<8x512xf32, #tpu.memory_space<vmem>>, vector<8x512xf32>,
    } else {
    }
    %c0 = arith.constant 0 : index
    %c0_1 = arith.constant 0 : index
    %3 = vector.load %arg1[%c0, %c0_1] : memref<8x512xf32, #tpu.memory_space<vmem>>, vector<8x512xf32>
    %c0_2 = arith.constant 0 : index
    %c0_3 = arith.constant 0 : index
    %4 = vector.load %arg2[%c0_2, %c0_3] : memref<8x512xf32, #tpu.memory_space<vmem>>, vector<8x512xf32>
    %5 = arith.mulf %3, %4 : vector<8x512xf32>
    %cst = arith.constant 1.000000e+00 : f32
    %6 = vector.broadcast %cst : f32 to vector<8x512xf32>
    %7 = arith.subf %6, %5 : vector<8x512xf32>
    %cst_4 = arith.constant 0.000000e+00 : f32
    %8 = vector.broadcast %cst_4 : f32 to vector<8x512xf32>
    %9 = arith.maximumf %7, %8 : vector<8x512xf32>
    %c0_5 = arith.constant 0 : index
    %c0_6 = arith.constant 0 : index
    %10 = vector.load %arg3[%c0_5, %c0_6] : memref<8x512xf32, #tpu.memory_space<vmem>>, vector<8x512xf32>
    %11 = arith.addf %10, %9 : vector<8x512xf32>
    %c0_7 = arith.constant 0 : index
    %c0_8 = arith.constant 0 : index
    %12 = vector.load %arg3[%c0_7, %c0_8] : memref<8x512xf32, #tpu.memory_space<vmem>>, vector<8x512xf32>
    tpu.vector_store %arg3[%c0_7, %c0_8], %11 {strides = array<i32>} : memref<8x512xf32, #tpu.memory_space<vmem>>, vector<8x512xf32>,
    return
  }
  func.func @transform_0(%arg0: i32) -> (i32, i32) {
    %c0_i32 = arith.constant 0 : i32
    %c0_i32_0 = arith.constant 0 : i32
    return %arg0, %c0_i32 : i32, i32
  }
  func.func @transform_1(%arg0: i32) -> (i32, i32) {
    %c0_i32 = arith.constant 0 : i32
    %c0_i32_0 = arith.constant 0 : i32
    return %arg0, %c0_i32 : i32, i32
  }
  func.func @transform_2(%arg0: i32) -> (i32, i32) {
    %c0_i32 = arith.constant 0 : i32
    %c0_i32_0 = arith.constant 0 : i32
    %c0_i32_1 = arith.constant 0 : i32
    return %c0_i32, %c0_i32_0 : i32, i32
  }
}

</mosaic_0001>

<bundles_post_ra>
// kernel: tpu_custom_call.1
= control target key start
LH: loop header
LB: loop body
LE: loop exit
PB: predicated region body
PF: predicated region fallthrough
CT: control target
= control target key end

     0   :  { %7 = vsyncpa [#allocation3], 0  ;;  %s222_s0 = inlined_call_operand.hbm [shape: f32[8,512], index: 0, kind: input, shape index: {}]   ;;  %s223_s1 = inlined_call_operand.hbm [shape: f32[8,512], index: 1, kind: input, shape index: {}]   ;;  %s224_s2 = inlined_call_operand.hbm [shape: f32[8,512], index: 2, kind: output, shape index: {}]  }
   0x1   :  { %8 = vsyncpa [#allocation6], 0 }
   0x2   :  { %9 = vsyncpa [#allocation4], 0  ;;  %s168_s9 = smov [#allocation2]   ;;  %s169_s11 = smov [#allocation5]  }
   0x3   :  { %s16_s10 = sshll.u32 %s168_s9, 4  ;;  %s26_s12 = sshll.u32 %s169_s11, 4  ;;  %s17_s10 = int_to_ptr.vmem [resolvable:$true] %s16_s10  ;;  %s27_s12 = int_to_ptr.vmem [resolvable:$true] %s26_s12 }
   0x4   :  { %s96_s15 = scalar_lea.hbm %s222_s0, 512 }
   0x5   :  { %p97_p0 = scmp.ne.s32.totalorder %s222_s0, %s96_s15  ;;  %p100_p1 = scmp.lt.u32.totalorder %s96_s15, %s222_s0 }
   0x7   :  { %p102_p2 = pnand %p100_p1, %p97_p0 }
   0x9   :  { %105 = shalt.err (!%p102_p2)
}
   0xa   :  { %s106_s20 = scalar_lea.vmem %s17_s10, 512  ;;  %p111_p4 = scmp.lt.s32.totalorder %s17_s10, %s17_s10 }
   0xb   :  { %p107_p3 = scmp.ne.s32.totalorder %s17_s10, %s106_s20  ;;  %p112_p5 = scmp.lt.s32.totalorder %s106_s20, %s106_s20 }
   0xd   :  { %p113_p6 = por %p112_p5, %p111_p4 }
   0xf   :  { %p114_p7 = pnand %p113_p6, %p107_p3 }
  0x11   :  { %117 = shalt.err (!%p114_p7)
}
  0x12   :  { %19 = dma.hbm_to_vmem [thread:$0]  %s222_s0, 512, %s17_s10, [#allocation3]  }
  0x13   :  { %s118_s25 = scalar_lea.hbm %s223_s1, 512 }
  0x14   :  { %p119_p8 = scmp.ne.s32.totalorder %s223_s1, %s118_s25  ;;  %p122_p9 = scmp.lt.u32.totalorder %s118_s25, %s223_s1 }
  0x16   :  { %p124_p10 = pnand %p122_p9, %p119_p8 }
  0x18   :  { %127 = shalt.err (!%p124_p10)
}
  0x19   :  { %s128_s30 = scalar_lea.vmem %s27_s12, 512  ;;  %p133_p12 = scmp.lt.s32.totalorder %s27_s12, %s27_s12 }
  0x1a   :  { %p129_p11 = scmp.ne.s32.totalorder %s27_s12, %s128_s30  ;;  %p134_p13 = scmp.lt.s32.totalorder %s128_s30, %s128_s30 }
  0x1c   :  { %p135_p0 = por %p134_p13, %p133_p12 }
  0x1e   :  { %p136_p1 = pnand %p135_p0, %p129_p11 }
  0x20   :  { %139 = shalt.err (!%p136_p1)
}
  0x21   :  { %29 = dma.hbm_to_vmem [thread:$0]  %s223_s1, 512, %s27_s12, [#allocation6]  }
  0x22   :  { %162 = dma.done.wait [#allocation3], 512  }
  0x23   :  { %163 = vsyncadd [#allocation3], 4294966784 }
  0x24   :  { %164 = dma.done.wait [#allocation6], 512  }
  0x25   :  { %165 = vsyncadd [#allocation6], 4294966784  ;;  %v44_v0 = vld [vmem:[#allocation2] sm:$0xff]  ;;  %v45_v2 = vld [vmem:[#allocation2 + $0x8] sm:$0xff]  ;;  %s170_s1 = smov [#allocation7]  }
  0x26   :  { %v48_v1 = vld [vmem:[#allocation5] sm:$0xff]  ;;  %v49_v4 = vld [vmem:[#allocation5 + $0x8] sm:$0xff]  ;;  %v46_v5 = vld [vmem:[#allocation2 + $0x10] sm:$0xff]  ;;  %s82_s4 = sshll.u32 %s170_s1, 4  ;;  %s83_s4 = int_to_ptr.vmem [resolvable:$true] %s82_s4 }
  0x27   :  { %v52_v3 = vmul.f32 %v48_v1, %v44_v0  ;;  %v50_v6 = vld [vmem:[#allocation5 + $0x10] sm:$0xff]  ;;  %v53_v7 = vmul.f32 %v49_v4, %v45_v2  ;;  %v47_v9 = vld [vmem:[#allocation2 + $0x18] sm:$0xff]  ;;  %s140_s5 = scalar_lea.vmem %s83_s4, 512  ;;  %p145_p3 = scmp.lt.s32.totalorder %s83_s4, %s83_s4 }
  0x28   :  { %v54_v8 = vmul.f32 %v50_v6, %v46_v5  ;;  %v51_v10 = vld [vmem:[#allocation5 + $0x18] sm:$0xff]  ;;  %p141_p2 = scmp.ne.s32.totalorder %s83_s4, %s140_s5  ;;  %p146_p4 = scmp.lt.s32.totalorder %s140_s5, %s140_s5 }
  0x29   :  { %v56_v11 = vsub.f32 1.0, %v52_v3  ;;  %v55_v12 = vmul.f32 %v51_v10, %v47_v9  ;;  %v57_v13 = vsub.f32 1.0, %v53_v7 }
  0x2a   :  { %v58_v14 = vsub.f32 1.0, %v54_v8  ;;  %p147_p5 = por %p146_p4, %p145_p3 }
  0x2b   :  { %v60_v15 = vmax.f32 %v56_v11, 0.0  ;;  %v59_v16 = vsub.f32 1.0, %v55_v12  ;;  %v61_v17 = vmax.f32 %v57_v13, 0.0 }
  0x2c   :  { %v62_v18 = vmax.f32 %v58_v14, 0.0  ;;  %p148_p6 = pnand %p147_p5, %p141_p2 }
  0x2d   :  { %v63_v19 = vmax.f32 %v59_v16, 0.0  ;;  %72 = vst [vmem:[#allocation7] sm:$0xff] %v60_v15  ;;  %73 = vst [vmem:[#allocation7 + $0x8] sm:$0xff] %v61_v17 }
  0x2e   :  { %74 = vst [vmem:[#allocation7 + $0x10] sm:$0xff] %v62_v18 }
  0x2f   :  { %75 = vst [vmem:[#allocation7 + $0x18] sm:$0xff] %v63_v19 }
  0x30   :  { %151 = shalt.err (!%p148_p6)
}
  0x31   :  { %s152_s8 = scalar_lea.hbm %s224_s2, 512 }
  0x32   :  { %p153_p7 = scmp.ne.s32.totalorder %s224_s2, %s152_s8  ;;  %p156_p8 = scmp.lt.u32.totalorder %s152_s8, %s224_s2 }
  0x34   :  { %p158_p9 = pnand %p156_p8, %p153_p7 }
  0x36   :  { %161 = shalt.err (!%p158_p9)
}
  0x37   :  { %85 = dma.vmem_to_hbm [thread:$0]  %s83_s4, 512, %s224_s2, [#allocation4]  }
  0x38   :  { %166 = dma.done.wait [#allocation4], 512  }
  0x39   :  { %167 = vsyncadd [#allocation4], 4294966784 }
  0x3a   :  { %89 = vsyncpa [#allocation3], 1 }
  0x3b   :  { %90 = vsyncpa [#allocation6], 1 }
  0x3c   :  { %91 = vsyncpa [#allocation4], 1 }

</bundles_post_ra>
